<compile_context>
chip_gen: v7x
topology: tpu7x:2x2x1
jax: 0.10.0
libtpu: 0.0.40
codegen_flags: <defaults>
</compile_context>

<pallas_src>
import jax
import jax.numpy as jnp
from jax import lax
from jax.experimental import pallas as pl
from jax.experimental.pallas import tpu as pltpu


# ---------------------------------------------------------------------------
# Helpers
# ---------------------------------------------------------------------------
def _round_up(n, m):
    return ((n + m - 1) // m) * m


def _pick_dt(D, cap):
    """Largest lane-dense D tile (multiple of 128) dividing D, capped. Assumes D % 128 == 0."""
    dt = min(D, cap)
    while D % dt:
        dt -= 128
    return max(dt, 128)


def _vmem_limit_bytes():
    """Generation-aware scoped-VMEM limit: ~3/4 of physical, capped at 96 MiB.

    v5e/v6e (128 MiB physical) -> 96 MiB; v7x (64 MiB) -> 48 MiB.
    """
    cap = 128 << 20
    try:
        cap = int(getattr(pltpu.get_tpu_info(), "vmem_capacity_bytes", cap))
    except Exception:
        pass
    return max(32 << 20, min(cap * 3 // 4, 96 << 20))


def _prep_filter(filt, L):
    """Filter as a time-major (L, D) f32 array with exactly L taps.

    Only taps s <= t < L contribute to the causal output, so truncating
    l_max > L is exact for the causal-conv semantics; l_max < L zero-pads.
    """
    f = filt.astype(jnp.float32)
    l_max = f.shape[1]
    f = f[:, :L] if l_max >= L else jnp.pad(f, ((0, 0), (0, L - l_max)))
    return jnp.transpose(f)  # (L, D)


# ---------------------------------------------------------------------------
# Small-L path (L < 64): time-domain causal depthwise conv on the VPU.
# ---------------------------------------------------------------------------
def _long_conv_td_kernel(x_ref, f_ref, o_ref, xpad_ref):
    # x_ref : (Bt, L, Dt)   input block
    # f_ref : (L, Dt)       filter, time-major, shared across the grid
    # o_ref : (Bt, L, Dt)
    # xpad  : (Bt, 2L, Dt)  f32 scratch: zero-padded copy of x (built once)
    Bt, L, Dt = x_ref.shape
    x = x_ref[...].astype(jnp.float32)

    # Zero-pad once; row L+t holds x[t], rows [0, L) are zero, so the view
    # "x shifted right by s" is rows [L-s, L-s+L).
    xpad_ref[:, 0:L, :] = jnp.zeros((Bt, L, Dt), jnp.float32)
    xpad_ref[:, L:2 * L, :] = x

    n_groups = L // 8  # one sublane group of 8 taps per loop iteration

    def group(g, acc):
        gbase = pl.multiple_of((n_groups - 1 - g) * 8, 8)        # == L - 8*(g+1)
        frows = f_ref[pl.ds(pl.multiple_of(g * 8, 8), 8), :].astype(jnp.float32)
        for r in range(8):                                       # tap s = 8g + r
            # Per-tap direct load (no >vreg-file "window" value to spill).
            shifted = xpad_ref[:, pl.ds(gbase + (8 - r), L), :]  # x shifted by s
            # TODO(synk): a stride-0 sublane-broadcast load of the tap row would
            # move this per-tap broadcast into the (slack) vld slots.
            acc = acc + shifted * frows[r:r + 1, :]
        return acc

    # Residual (out = conv + x) folded into the init; f32 accumulation.
    # <= 7 groups since L < 64, so a full unroll gives the LLO scheduler visibility.
    acc = lax.fori_loop(0, n_groups, group, x, unroll=True)
    o_ref[...] = acc.astype(o_ref.dtype)


def _long_conv_td(x, f_t, vmem_limit):
    B, L, D = x.shape
    assert L % 8 == 0 and L >= 8
    Dt = _pick_dt(D, cap=256)
    # Keep the f32 accumulator small enough to stay in vregs (<= 64 KiB) and the
    # per-step working set well inside the VMEM budget.
    Bt = 1
    for bt in range(min(B, 8), 0, -1):
        if B % bt:
            continue
        acc_bytes = bt * L * Dt * 4
        ws = (4 * bt * L * Dt * x.dtype.itemsize   # x + out, double-buffered
              + bt * 2 * L * Dt * 4                # xpad scratch
              + 2 * L * Dt * 4)                    # filter, double-buffered
        if acc_bytes <= (64 << 10) and ws <= vmem_limit // 2:
            Bt = bt
            break
    # v7x megacore: prefer >= 2 grid steps so both TensorCores get work.
    if (B // Bt) * (D // Dt) < 2:
        if Bt > 1:
            for bt in range(Bt - 1, 0, -1):
                if B % bt == 0:
                    Bt = bt
                    break
        elif D >= 256:
            Dt = 128

    return pl.pallas_call(
        _long_conv_td_kernel,
        out_shape=jax.ShapeDtypeStruct((B, L, D), x.dtype),
        grid_spec=pltpu.PrefetchScalarGridSpec(
            num_scalar_prefetch=0,
            grid=(B // Bt, D // Dt),
            in_specs=[
                pl.BlockSpec((Bt, L, Dt), lambda i, j: (i, 0, j)),
                pl.BlockSpec((L, Dt), lambda i, j: (0, j)),
            ],
            out_specs=pl.BlockSpec((Bt, L, Dt), lambda i, j: (i, 0, j)),
            scratch_shapes=[pltpu.VMEM((Bt, 2 * L, Dt), jnp.float32)],
        ),
        compiler_params=pltpu.CompilerParams(
            dimension_semantics=("parallel", "parallel"),
            vmem_limit_bytes=vmem_limit,
        ),
    )(x, f_t)


# ---------------------------------------------------------------------------
# Large-L path (L >= 64): rDFT-as-matmul on the MXU (FlashFFTConv-style).
# ---------------------------------------------------------------------------
def _long_conv_dft_kernel(x_ref, fst_ref, ist_ref, kre_ref, kim_ref, o_ref):
    # x_ref  : (Bt, L, Dt)
    # fst    : (2*Nf, L) bf16   [F_re; F_im]   forward rDFT of the zero-padded signal
    # ist    : (L, 2*Nf) bf16   [i_c | -i_s]   inverse rDFT restricted to first L samples
    # kre/kim: (Nf, Dt)  f32    rfft(filter, n=2L) — frequency-domain filter
    Bt = x_ref.shape[0]
    Nf = kre_ref.shape[0]
    fst = fst_ref[...]
    ist = ist_ref[...]
    kre = kre_ref[...]
    kim = kim_ref[...]
    for b in range(Bt):  # small static loop: reuses the resident DFT matrices
        xb = x_ref[b]                                            # (L, Dt)
        # Forward rDFT: one fused bf16 MXU matmul -> stacked [Xr; Xi], f32 acc.
        xs = jnp.dot(fst, xb.astype(jnp.bfloat16),
                     preferred_element_type=jnp.float32)         # (2Nf, Dt)
        xr, xi = xs[:Nf], xs[Nf:]
        # Pointwise complex multiply with the filter spectrum (VPU, f32).
        yr = xr * kre - xi * kim
        yi = xr * kim + xi * kre
        ys = jnp.concatenate([yr, yi], axis=0).astype(jnp.bfloat16)    # (2Nf, Dt)
        # Inverse rDFT (first L samples): one fused bf16 MXU matmul, f32 acc.
        y = jnp.dot(ist, ys, preferred_element_type=jnp.float32)       # (L, Dt)
        o_ref[b] = (y + xb.astype(jnp.float32)).astype(o_ref.dtype)    # residual


def _long_conv_dft(x, f_t, vmem_limit):
    B, L, D = x.shape
    N = 2 * L
    n_bins = L + 1                   # rfft bins of a real length-2L signal
    Nf = _round_up(n_bins, 128)      # padded: lane/sublane friendly, padded bins are zeroed

    kk = jnp.arange(Nf, dtype=jnp.int32)
    tt = jnp.arange(L, dtype=jnp.int32)
    valid = kk < n_bins
    # Angles reduced with an exact integer mod so cos/sin stay accurate.
    ang_f = (2.0 * jnp.pi / N) * ((kk[:, None] * tt[None, :]) % N).astype(jnp.float32)
    f_re = jnp.where(valid[:, None], jnp.cos(ang_f), 0.0)
    f_im = jnp.where(valid[:, None], -jnp.sin(ang_f), 0.0)
    f_stack = jnp.concatenate([f_re, f_im], axis=0).astype(jnp.bfloat16)   # (2Nf, L)

    # Real-output inverse: y[t] = sum_k w[k]/N * (cos(2pi kt/N) Yr[k] - sin(2pi kt/N) Yi[k]);
    # w = 1 for DC/Nyquist, 2 for interior bins (Hermitian symmetry), 0 for padding.
    w = jnp.where((kk == 0) | (kk == L), 1.0, 2.0) * valid.astype(jnp.float32)
    ang_i = (2.0 * jnp.pi / N) * ((tt[:, None] * kk[None, :]) % N).astype(jnp.float32)
    i_c = jnp.cos(ang_i) * (w / N)[None, :]
    i_s = jnp.sin(ang_i) * (w / N)[None, :]
    i_stack = jnp.concatenate([i_c, -i_s], axis=1).astype(jnp.bfloat16)    # (L, 2Nf)

    # Frequency-domain filter (one-time parameter transform; kept f32 for the
    # pointwise complex multiply).
    k_f = jnp.fft.rfft(f_t, n=N, axis=0)                                   # (L+1, D) c64
    pad = ((0, Nf - n_bins), (0, 0))
    k_re = jnp.pad(jnp.real(k_f).astype(jnp.float32), pad)                 # (Nf, D)
    k_im = jnp.pad(jnp.imag(k_f).astype(jnp.float32), pad)

    Dt = _pick_dt(D, cap=256)

    def blk_bytes(bt, dt):
        const = 2 * 2 * (2 * Nf * L * 2)                 # F/I stacks (bf16), double-buffered
        const += 2 * 2 * (Nf * dt * 4)                   # kre + kim (f32), double-buffered
        io = 2 * 2 * (bt * L * dt * x.dtype.itemsize)    # x + out, double-buffered
        tmp = 8 * Nf * dt * 4 + 2 * L * dt * 4           # in-kernel intermediates
        return const + io + tmp

    Bt = 1
    for bt in range(min(B, 8), 0, -1):                   # Bt >= 2 amortizes the per-step cost
        if B % bt == 0 and blk_bytes(bt, Dt) <= int(vmem_limit * 0.6):
            Bt = bt
            break
    # v7x megacore: prefer >= 2 grid steps; for small B split D rather than idling a core.
    if (B // Bt) * (D // Dt) < 2:
        if D >= 256:
            Dt = 128
        elif Bt > 1:
            for bt in range(Bt - 1, 0, -1):
                if B % bt == 0:
                    Bt = bt
                    break

    # TODO(synk): for very long L on v7x (64 MiB VMEM) the constant DFT matrices should
    # additionally get pipeline_mode=pl.Buffered(1) or a frequency-chunked grid axis with
    # a VMEM accumulator; bf16 + rfft symmetry already shrinks them ~8x vs f32/2L matrices.
    return pl.pallas_call(
        _long_conv_dft_kernel,
        out_shape=jax.ShapeDtypeStruct((B, L, D), x.dtype),
        grid_spec=pltpu.PrefetchScalarGridSpec(
            num_scalar_prefetch=0,
            grid=(B // Bt, D // Dt),
            in_specs=[
                pl.BlockSpec((Bt, L, Dt), lambda i, j: (i, 0, j)),
                pl.BlockSpec((2 * Nf, L), lambda i, j: (0, 0)),
                pl.BlockSpec((L, 2 * Nf), lambda i, j: (0, 0)),
                pl.BlockSpec((Nf, Dt), lambda i, j: (0, j)),
                pl.BlockSpec((Nf, Dt), lambda i, j: (0, j)),
            ],
            out_specs=pl.BlockSpec((Bt, L, Dt), lambda i, j: (i, 0, j)),
        ),
        compiler_params=pltpu.CompilerParams(
            dimension_semantics=("parallel", "parallel"),
            vmem_limit_bytes=vmem_limit,
        ),
    )(x, f_stack, i_stack, k_re, k_im)


# ---------------------------------------------------------------------------
# Public entry point (forward pass of LongConvolution)
# ---------------------------------------------------------------------------
def long_convolution(x, filt):
    """x: (B, L, D); filt: (D, l_max). Returns (B, L, D) with x.dtype."""
    B, L, D = x.shape
    assert filt.shape[0] == D
    vmem_limit = _vmem_limit_bytes()

    # Lane-dense channels: pad d_model to a multiple of 128 so stores are full
    # (unmasked) vst's and the BlockSpec tiling stays (8,128)-aligned.
    Dp = _round_up(D, 128)
    if Dp != D:
        x_in = jnp.pad(x, ((0, 0), (0, 0), (0, Dp - D)))
        filt_in = jnp.pad(filt, ((0, Dp - D), (0, 0)))
    else:
        x_in, filt_in = x, filt

    f_t = _prep_filter(filt_in, L)       # (L, Dp) f32, time-major

    # Small L stays on the time-domain VPU path; everything else runs the
    # DFT-as-matmul MXU path (the TD path is VALU-bound well before L=128).
    if 8 <= L < 64 and L % 8 == 0:
        out = _long_conv_td(x_in, f_t, vmem_limit)
    else:
        out = _long_conv_dft(x_in, f_t, vmem_limit)
    return out[:, :, :D] if Dp != D else out


def _fft_conv_reference(x, filt):
    """Pure-JAX mirror of the PyTorch fft_conv path (validation only)."""
    u = jnp.swapaxes(x, 1, 2)                          # (B, D, L)
    L = u.shape[-1]
    n = 2 * L
    k_f = jnp.fft.rfft(filt.astype(jnp.float32), n=n) / n
    u_f = jnp.fft.rfft(u.astype(jnp.float32), n=n)
    y = jnp.fft.irfft(u_f * k_f, n=n, norm="forward")[..., :L]
    out = y + u
    return jnp.swapaxes(out, 1, 2).astype(x.dtype)


if __name__ == "__main__":
    key = jax.random.PRNGKey(0)
    k1, k2, k3, k4 = jax.random.split(key, 4)

    # Small config (time-domain / VPU path): d_model=128, l_max=16, batch=2.
    B, L, D = 2, 16, 128
    x = jax.random.normal(k1, (B, L, D), dtype=jnp.float32)        # (b, l, d)
    filt = jax.random.normal(k2, (D, L), dtype=jnp.float32)        # (d, l_max)
    y = jax.block_until_ready(long_convolution(x, filt))
    y_ref = _fft_conv_reference(x, filt)
    assert y.shape == (B, L, D) and y.dtype == x.dtype
    assert jnp.allclose(y, y_ref, atol=1e-3, rtol=1e-3), "time-domain path mismatch"

    # Config exercising the rDFT-as-matmul / MXU path (L >= 64, bf16 operands).
    B2, L2, D2 = 2, 256, 256
    x2 = jax.random.normal(k3, (B2, L2, D2), dtype=jnp.float32)
    filt2 = jax.random.normal(k4, (D2, L2), dtype=jnp.float32)
    y2 = jax.block_until_ready(long_convolution(x2, filt2))
    y2_ref = _fft_conv_reference(x2, filt2)
    assert y2.shape == (B2, L2, D2) and y2.dtype == x2.dtype
    # bf16 MXU operands with f32 accumulation: validate error relative to output scale.
    diff = (y2 - y2_ref).astype(jnp.float32)
    rel_l2 = float(jnp.linalg.norm(diff) / (jnp.linalg.norm(y2_ref) + 1e-6))
    max_err = float(jnp.max(jnp.abs(diff)))
    scale = float(jnp.max(jnp.abs(y2_ref)))
    assert rel_l2 <= 2e-2, f"DFT path relative L2 error too large: {rel_l2}"
    assert max_err <= 0.1 * scale + 1e-2, f"DFT path max error too large: {max_err} vs scale {scale}"

    print("KERNEL_OK")
</pallas_src>

<mosaic_0001>
module attributes {stable_mosaic.version = 11 : i64} {
  func.func @_long_conv_td_kernel(%arg0: i32, %arg1: i32, %arg2: memref<1x16x128xf32, #tpu.memory_space<vmem>>, %arg3: memref<16x128xf32, #tpu.memory_space<vmem>>, %arg4: memref<1x16x128xf32, #tpu.memory_space<vmem>>, %arg5: memref<1x32x128xf32, #tpu.memory_space<vmem>>) attributes {dimension_semantics = [#tpu.dimension_semantics<parallel>, #tpu.dimension_semantics<parallel>], iteration_bounds = array<i64: 2, 1>, scalar_prefetch = 0 : i64, scratch_operands = 1 : i64, tpu.core_type = #tpu.core_type<tc>, window_params = [{transform_indices = @transform_0, window_bounds = array<i64: 1, 16, 128>}, {transform_indices = @transform_1, window_bounds = array<i64: 16, 128>}, {transform_indices = @transform_2, window_bounds = array<i64: 1, 16, 128>}]} {
    %c0 = arith.constant 0 : index
    %c0_0 = arith.constant 0 : index
    %c0_1 = arith.constant 0 : index
    %0 = vector.load %arg2[%c0, %c0_0, %c0_1] : memref<1x16x128xf32, #tpu.memory_space<vmem>>, vector<1x16x128xf32>
    %cst = arith.constant 0.000000e+00 : f32
    %1 = vector.broadcast %cst : f32 to vector<1x16x128xf32>
    %c0_2 = arith.constant 0 : index
    %c0_3 = arith.constant 0 : index
    %c0_4 = arith.constant 0 : index
    %2 = vector.load %arg5[%c0_2, %c0_3, %c0_4] : memref<1x32x128xf32, #tpu.memory_space<vmem>>, vector<1x16x128xf32>
    tpu.vector_store %arg5[%c0_2, %c0_3, %c0_4], %1 {strides = array<i32>} : memref<1x32x128xf32, #tpu.memory_space<vmem>>, vector<1x16x128xf32>,
    %c0_5 = arith.constant 0 : index
    %c16 = arith.constant 16 : index
    %c0_6 = arith.constant 0 : index
    %3 = vector.load %arg5[%c0_5, %c16, %c0_6] : memref<1x32x128xf32, #tpu.memory_space<vmem>>, vector<1x16x128xf32>
    tpu.vector_store %arg5[%c0_5, %c16, %c0_6], %0 {strides = array<i32>} : memref<1x32x128xf32, #tpu.memory_space<vmem>>, vector<1x16x128xf32>,
    %c0_i32 = arith.constant 0 : i32
    %c1_i32 = arith.constant 1 : i32
    %4 = arith.subi %c1_i32, %c0_i32 : i32
    %c8_i32 = arith.constant 8 : i32
    %5 = arith.muli %4, %c8_i32 : i32
    %6 = tpu.assume_multiple %5, 8 : i32
    %c8_i32_7 = arith.constant 8 : i32
    %7 = arith.muli %c0_i32, %c8_i32_7 : i32
    %8 = tpu.assume_multiple %7, 8 : i32
    %9 = arith.index_cast %8 : i32 to index
    %c0_8 = arith.constant 0 : index
    %10 = vector.load %arg3[%9, %c0_8] : memref<16x128xf32, #tpu.memory_space<vmem>>, vector<8x128xf32>
    %c8_i32_9 = arith.constant 8 : i32
    %11 = arith.addi %6, %c8_i32_9 : i32
    %c0_10 = arith.constant 0 : index
    %12 = arith.index_cast %11 : i32 to index
    %c0_11 = arith.constant 0 : index
    %13 = vector.load %arg5[%c0_10, %12, %c0_11] : memref<1x32x128xf32, #tpu.memory_space<vmem>>, vector<1x16x128xf32>
    %14 = vector.extract_strided_slice %10 {offsets = [0, 0], sizes = [1, 128], strides = [1, 1]} : vector<8x128xf32> to vector<1x128xf32>
    %15 = vector.shape_cast %14 : vector<1x128xf32> to vector<1x1x128xf32>
    %16 = vector.broadcast %15 : vector<1x1x128xf32> to vector<1x16x128xf32>
    %17 = arith.mulf %13, %16 : vector<1x16x128xf32>
    %18 = arith.addf %0, %17 : vector<1x16x128xf32>
    %c7_i32 = arith.constant 7 : i32
    %19 = arith.addi %6, %c7_i32 : i32
    %c0_12 = arith.constant 0 : index
    %20 = arith.index_cast %19 : i32 to index
    %c0_13 = arith.constant 0 : index
    %21 = vector.load %arg5[%c0_12, %20, %c0_13] : memref<1x32x128xf32, #tpu.memory_space<vmem>>, vector<1x16x128xf32>
    %22 = vector.extract_strided_slice %10 {offsets = [1, 0], sizes = [1, 128], strides = [1, 1]} : vector<8x128xf32> to vector<1x128xf32>
    %23 = vector.shape_cast %22 : vector<1x128xf32> to vector<1x1x128xf32>
    %24 = vector.broadcast %23 : vector<1x1x128xf32> to vector<1x16x128xf32>
    %25 = arith.mulf %21, %24 : vector<1x16x128xf32>
    %26 = arith.addf %18, %25 : vector<1x16x128xf32>
    %c6_i32 = arith.constant 6 : i32
    %27 = arith.addi %6, %c6_i32 : i32
    %c0_14 = arith.constant 0 : index
    %28 = arith.index_cast %27 : i32 to index
    %c0_15 = arith.constant 0 : index
    %29 = vector.load %arg5[%c0_14, %28, %c0_15] : memref<1x32x128xf32, #tpu.memory_space<vmem>>, vector<1x16x128xf32>
    %30 = vector.extract_strided_slice %10 {offsets = [2, 0], sizes = [1, 128], strides = [1, 1]} : vector<8x128xf32> to vector<1x128xf32>
    %31 = vector.shape_cast %30 : vector<1x128xf32> to vector<1x1x128xf32>
    %32 = vector.broadcast %31 : vector<1x1x128xf32> to vector<1x16x128xf32>
    %33 = arith.mulf %29, %32 : vector<1x16x128xf32>
    %34 = arith.addf %26, %33 : vector<1x16x128xf32>
    %c5_i32 = arith.constant 5 : i32
    %35 = arith.addi %6, %c5_i32 : i32
    %c0_16 = arith.constant 0 : index
    %36 = arith.index_cast %35 : i32 to index
    %c0_17 = arith.constant 0 : index
    %37 = vector.load %arg5[%c0_16, %36, %c0_17] : memref<1x32x128xf32, #tpu.memory_space<vmem>>, vector<1x16x128xf32>
    %38 = vector.extract_strided_slice %10 {offsets = [3, 0], sizes = [1, 128], strides = [1, 1]} : vector<8x128xf32> to vector<1x128xf32>
    %39 = vector.shape_cast %38 : vector<1x128xf32> to vector<1x1x128xf32>
    %40 = vector.broadcast %39 : vector<1x1x128xf32> to vector<1x16x128xf32>
    %41 = arith.mulf %37, %40 : vector<1x16x128xf32>
    %42 = arith.addf %34, %41 : vector<1x16x128xf32>
    %c4_i32 = arith.constant 4 : i32
    %43 = arith.addi %6, %c4_i32 : i32
    %c0_18 = arith.constant 0 : index
    %44 = arith.index_cast %43 : i32 to index
    %c0_19 = arith.constant 0 : index
    %45 = vector.load %arg5[%c0_18, %44, %c0_19] : memref<1x32x128xf32, #tpu.memory_space<vmem>>, vector<1x16x128xf32>
    %46 = vector.extract_strided_slice %10 {offsets = [4, 0], sizes = [1, 128], strides = [1, 1]} : vector<8x128xf32> to vector<1x128xf32>
    %47 = vector.shape_cast %46 : vector<1x128xf32> to vector<1x1x128xf32>
    %48 = vector.broadcast %47 : vector<1x1x128xf32> to vector<1x16x128xf32>
    %49 = arith.mulf %45, %48 : vector<1x16x128xf32>
    %50 = arith.addf %42, %49 : vector<1x16x128xf32>
    %c3_i32 = arith.constant 3 : i32
    %51 = arith.addi %6, %c3_i32 : i32
    %c0_20 = arith.constant 0 : index
    %52 = arith.index_cast %51 : i32 to index
    %c0_21 = arith.constant 0 : index
    %53 = vector.load %arg5[%c0_20, %52, %c0_21] : memref<1x32x128xf32, #tpu.memory_space<vmem>>, vector<1x16x128xf32>
    %54 = vector.extract_strided_slice %10 {offsets = [5, 0], sizes = [1, 128], strides = [1, 1]} : vector<8x128xf32> to vector<1x128xf32>
    %55 = vector.shape_cast %54 : vector<1x128xf32> to vector<1x1x128xf32>
    %56 = vector.broadcast %55 : vector<1x1x128xf32> to vector<1x16x128xf32>
    %57 = arith.mulf %53, %56 : vector<1x16x128xf32>
    %58 = arith.addf %50, %57 : vector<1x16x128xf32>
    %c2_i32 = arith.constant 2 : i32
    %59 = arith.addi %6, %c2_i32 : i32
    %c0_22 = arith.constant 0 : index
    %60 = arith.index_cast %59 : i32 to index
    %c0_23 = arith.constant 0 : index
    %61 = vector.load %arg5[%c0_22, %60, %c0_23] : memref<1x32x128xf32, #tpu.memory_space<vmem>>, vector<1x16x128xf32>
    %62 = vector.extract_strided_slice %10 {offsets = [6, 0], sizes = [1, 128], strides = [1, 1]} : vector<8x128xf32> to vector<1x128xf32>
    %63 = vector.shape_cast %62 : vector<1x128xf32> to vector<1x1x128xf32>
    %64 = vector.broadcast %63 : vector<1x1x128xf32> to vector<1x16x128xf32>
    %65 = arith.mulf %61, %64 : vector<1x16x128xf32>
    %66 = arith.addf %58, %65 : vector<1x16x128xf32>
    %c1_i32_24 = arith.constant 1 : i32
    %67 = arith.addi %6, %c1_i32_24 : i32
    %c0_25 = arith.constant 0 : index
    %68 = arith.index_cast %67 : i32 to index
    %c0_26 = arith.constant 0 : index
    %69 = vector.load %arg5[%c0_25, %68, %c0_26] : memref<1x32x128xf32, #tpu.memory_space<vmem>>, vector<1x16x128xf32>
    %70 = vector.extract_strided_slice %10 {offsets = [7, 0], sizes = [1, 128], strides = [1, 1]} : vector<8x128xf32> to vector<1x128xf32>
    %71 = vector.shape_cast %70 : vector<1x128xf32> to vector<1x1x128xf32>
    %72 = vector.broadcast %71 : vector<1x1x128xf32> to vector<1x16x128xf32>
    %73 = arith.mulf %69, %72 : vector<1x16x128xf32>
    %74 = arith.addf %66, %73 : vector<1x16x128xf32>
    %c1_i32_27 = arith.constant 1 : i32
    %c1_i32_28 = arith.constant 1 : i32
    %75 = arith.subi %c1_i32_28, %c1_i32_27 : i32
    %c8_i32_29 = arith.constant 8 : i32
    %76 = arith.muli %75, %c8_i32_29 : i32
    %77 = tpu.assume_multiple %76, 8 : i32
    %c8_i32_30 = arith.constant 8 : i32
    %78 = arith.muli %c1_i32_27, %c8_i32_30 : i32
    %79 = tpu.assume_multiple %78, 8 : i32
    %80 = arith.index_cast %79 : i32 to index
    %c0_31 = arith.constant 0 : index
    %81 = vector.load %arg3[%80, %c0_31] : memref<16x128xf32, #tpu.memory_space<vmem>>, vector<8x128xf32>
    %c8_i32_32 = arith.constant 8 : i32
    %82 = arith.addi %77, %c8_i32_32 : i32
    %c0_33 = arith.constant 0 : index
    %83 = arith.index_cast %82 : i32 to index
    %c0_34 = arith.constant 0 : index
    %84 = vector.load %arg5[%c0_33, %83, %c0_34] : memref<1x32x128xf32, #tpu.memory_space<vmem>>, vector<1x16x128xf32>
    %85 = vector.extract_strided_slice %81 {offsets = [0, 0], sizes = [1, 128], strides = [1, 1]} : vector<8x128xf32> to vector<1x128xf32>
    %86 = vector.shape_cast %85 : vector<1x128xf32> to vector<1x1x128xf32>
    %87 = vector.broadcast %86 : vector<1x1x128xf32> to vector<1x16x128xf32>
    %88 = arith.mulf %84, %87 : vector<1x16x128xf32>
    %89 = arith.addf %74, %88 : vector<1x16x128xf32>
    %c7_i32_35 = arith.constant 7 : i32
    %90 = arith.addi %77, %c7_i32_35 : i32
    %c0_36 = arith.constant 0 : index
    %91 = arith.index_cast %90 : i32 to index
    %c0_37 = arith.constant 0 : index
    %92 = vector.load %arg5[%c0_36, %91, %c0_37] : memref<1x32x128xf32, #tpu.memory_space<vmem>>, vector<1x16x128xf32>
    %93 = vector.extract_strided_slice %81 {offsets = [1, 0], sizes = [1, 128], strides = [1, 1]} : vector<8x128xf32> to vector<1x128xf32>
    %94 = vector.shape_cast %93 : vector<1x128xf32> to vector<1x1x128xf32>
    %95 = vector.broadcast %94 : vector<1x1x128xf32> to vector<1x16x128xf32>
    %96 = arith.mulf %92, %95 : vector<1x16x128xf32>
    %97 = arith.addf %89, %96 : vector<1x16x128xf32>
    %c6_i32_38 = arith.constant 6 : i32
    %98 = arith.addi %77, %c6_i32_38 : i32
    %c0_39 = arith.constant 0 : index
    %99 = arith.index_cast %98 : i32 to index
    %c0_40 = arith.constant 0 : index
    %100 = vector.load %arg5[%c0_39, %99, %c0_40] : memref<1x32x128xf32, #tpu.memory_space<vmem>>, vector<1x16x128xf32>
    %101 = vector.extract_strided_slice %81 {offsets = [2, 0], sizes = [1, 128], strides = [1, 1]} : vector<8x128xf32> to vector<1x128xf32>
    %102 = vector.shape_cast %101 : vector<1x128xf32> to vector<1x1x128xf32>
    %103 = vector.broadcast %102 : vector<1x1x128xf32> to vector<1x16x128xf32>
    %104 = arith.mulf %100, %103 : vector<1x16x128xf32>
    %105 = arith.addf %97, %104 : vector<1x16x128xf32>
    %c5_i32_41 = arith.constant 5 : i32
    %106 = arith.addi %77, %c5_i32_41 : i32
    %c0_42 = arith.constant 0 : index
    %107 = arith.index_cast %106 : i32 to index
    %c0_43 = arith.constant 0 : index
    %108 = vector.load %arg5[%c0_42, %107, %c0_43] : memref<1x32x128xf32, #tpu.memory_space<vmem>>, vector<1x16x128xf32>
    %109 = vector.extract_strided_slice %81 {offsets = [3, 0], sizes = [1, 128], strides = [1, 1]} : vector<8x128xf32> to vector<1x128xf32>
    %110 = vector.shape_cast %109 : vector<1x128xf32> to vector<1x1x128xf32>
    %111 = vector.broadcast %110 : vector<1x1x128xf32> to vector<1x16x128xf32>
    %112 = arith.mulf %108, %111 : vector<1x16x128xf32>
    %113 = arith.addf %105, %112 : vector<1x16x128xf32>
    %c4_i32_44 = arith.constant 4 : i32
    %114 = arith.addi %77, %c4_i32_44 : i32
    %c0_45 = arith.constant 0 : index
    %115 = arith.index_cast %114 : i32 to index
    %c0_46 = arith.constant 0 : index
    %116 = vector.load %arg5[%c0_45, %115, %c0_46] : memref<1x32x128xf32, #tpu.memory_space<vmem>>, vector<1x16x128xf32>
    %117 = vector.extract_strided_slice %81 {offsets = [4, 0], sizes = [1, 128], strides = [1, 1]} : vector<8x128xf32> to vector<1x128xf32>
    %118 = vector.shape_cast %117 : vector<1x128xf32> to vector<1x1x128xf32>
    %119 = vector.broadcast %118 : vector<1x1x128xf32> to vector<1x16x128xf32>
    %120 = arith.mulf %116, %119 : vector<1x16x128xf32>
    %121 = arith.addf %113, %120 : vector<1x16x128xf32>
    %c3_i32_47 = arith.constant 3 : i32
    %122 = arith.addi %77, %c3_i32_47 : i32
    %c0_48 = arith.constant 0 : index
    %123 = arith.index_cast %122 : i32 to index
    %c0_49 = arith.constant 0 : index
    %124 = vector.load %arg5[%c0_48, %123, %c0_49] : memref<1x32x128xf32, #tpu.memory_space<vmem>>, vector<1x16x128xf32>
    %125 = vector.extract_strided_slice %81 {offsets = [5, 0], sizes = [1, 128], strides = [1, 1]} : vector<8x128xf32> to vector<1x128xf32>
    %126 = vector.shape_cast %125 : vector<1x128xf32> to vector<1x1x128xf32>
    %127 = vector.broadcast %126 : vector<1x1x128xf32> to vector<1x16x128xf32>
    %128 = arith.mulf %124, %127 : vector<1x16x128xf32>
    %129 = arith.addf %121, %128 : vector<1x16x128xf32>
    %c2_i32_50 = arith.constant 2 : i32
    %130 = arith.addi %77, %c2_i32_50 : i32
    %c0_51 = arith.constant 0 : index
    %131 = arith.index_cast %130 : i32 to index
    %c0_52 = arith.constant 0 : index
    %132 = vector.load %arg5[%c0_51, %131, %c0_52] : memref<1x32x128xf32, #tpu.memory_space<vmem>>, vector<1x16x128xf32>
    %133 = vector.extract_strided_slice %81 {offsets = [6, 0], sizes = [1, 128], strides = [1, 1]} : vector<8x128xf32> to vector<1x128xf32>
    %134 = vector.shape_cast %133 : vector<1x128xf32> to vector<1x1x128xf32>
    %135 = vector.broadcast %134 : vector<1x1x128xf32> to vector<1x16x128xf32>
    %136 = arith.mulf %132, %135 : vector<1x16x128xf32>
    %137 = arith.addf %129, %136 : vector<1x16x128xf32>
    %c1_i32_53 = arith.constant 1 : i32
    %138 = arith.addi %77, %c1_i32_53 : i32
    %c0_54 = arith.constant 0 : index
    %139 = arith.index_cast %138 : i32 to index
    %c0_55 = arith.constant 0 : index
    %140 = vector.load %arg5[%c0_54, %139, %c0_55] : memref<1x32x128xf32, #tpu.memory_space<vmem>>, vector<1x16x128xf32>
    %141 = vector.extract_strided_slice %81 {offsets = [7, 0], sizes = [1, 128], strides = [1, 1]} : vector<8x128xf32> to vector<1x128xf32>
    %142 = vector.shape_cast %141 : vector<1x128xf32> to vector<1x1x128xf32>
    %143 = vector.broadcast %142 : vector<1x1x128xf32> to vector<1x16x128xf32>
    %144 = arith.mulf %140, %143 : vector<1x16x128xf32>
    %145 = arith.addf %137, %144 : vector<1x16x128xf32>
    %c2_i32_56 = arith.constant 2 : i32
    %c0_57 = arith.constant 0 : index
    %c0_58 = arith.constant 0 : index
    %c0_59 = arith.constant 0 : index
    %146 = vector.load %arg4[%c0_57, %c0_58, %c0_59] : memref<1x16x128xf32, #tpu.memory_space<vmem>>, vector<1x16x128xf32>
    tpu.vector_store %arg4[%c0_57, %c0_58, %c0_59], %145 {strides = array<i32>} : memref<1x16x128xf32, #tpu.memory_space<vmem>>, vector<1x16x128xf32>,
    return
  }
  func.func @transform_0(%arg0: i32, %arg1: i32) -> (i32, i32, i32) {
    %c0_i32 = arith.constant 0 : i32
    %c0_i32_0 = arith.constant 0 : i32
    return %arg0, %c0_i32, %arg1 : i32, i32, i32
  }
  func.func @transform_1(%arg0: i32, %arg1: i32) -> (i32, i32) {
    %c0_i32 = arith.constant 0 : i32
    %c0_i32_0 = arith.constant 0 : i32
    return %c0_i32, %arg1 : i32, i32
  }
  func.func @transform_2(%arg0: i32, %arg1: i32) -> (i32, i32, i32) {
    %c0_i32 = arith.constant 0 : i32
    %c0_i32_0 = arith.constant 0 : i32
    return %arg0, %c0_i32, %arg1 : i32, i32, i32
  }
}

</mosaic_0001>

<bundles_post_ra>
// kernel: tpu_custom_call.1
= control target key start
LH: loop header
LB: loop body
LE: loop exit
PB: predicated region body
PF: predicated region fallthrough
CT: control target
= control target key end

     0   :  { %7 = vsyncpa [#allocation4], 0  ;;  %s1079_s0 = inlined_call_operand.hbm [shape: f32[2,16,128], index: 0, kind: input, shape index: {}]   ;;  %s1080_s1 = inlined_call_operand.hbm [shape: f32[16,128], index: 1, kind: input, shape index: {}]   ;;  %s1081_s2 = inlined_call_operand.hbm [shape: f32[2,16,128], index: 2, kind: output, shape index: {}]  }
   0x1   :  { %9 = vsyncpa [#allocation4 + $0x1], 0 }
   0x2   :  { %10 = vsyncpa [#allocation7], 0 }
   0x3   :  { %11 = vsyncpa [#allocation5], 0 }
   0x4   :  { %13 = vsyncpa [#allocation5 + $0x1], 0  ;;  %s798_s9 = smov 0   ;;  %s800_s10 = smov 0  }
   0x5   :  { %s802_s11 = smov 0   ;;  %s804_s12 = smov 0  }
   0x6   :  { %s806_s13 = smov 0   ;;  %s808_s14 = smov 0  }
   0x7 LB: > { %s532_s15 = sadd.s32 4294967295, %s773_s14   ;;  %s533_s16 = sadd.s32 4294967294, %s773_s14   ;;  %s773_s14 = sphi %s808_s14, %s19_s14   ;;  %s769_s13 = sphi %s806_s13, %s1105_s13   ;;  %s765_s12 = sphi %s804_s12, %s1104_s12   ;;  %s761_s11 = sphi %s802_s11, %s1103_s11   ;;  %s757_s10 = sphi %s800_s10, %s1102_s10   ;;  %s753_s9 = sphi %s798_s9, %s1101_s9  }
   0x8   : > { %p53_p0 = scmp.ne.s32.totalorder %s757_s10, %s753_s9  ;;  %p832_p1 = scmp.eq.s32.totalorder %s532_s15, 0 }
   0x9   : > { %p836_p2 = scmp.eq.s32.totalorder %s532_s15, 1  ;;  %p111_p3 = scmp.eq.s32.totalorder %s533_s16, 1 }
   0xa   : > { %s1086_s17 = scalar_select %p832_p1, 1, 0 }
   0xb   : > { %s1087_s18 = scalar_select %p836_p2, 1, 0 }
   0xc   : > { %p842_p4 = por %p832_p1, %p53_p0  ;;  %p534_p5 = scmp.ge.s32.totalorder %s773_s14, 1 }
   0xd   : > { %p847_p6 = por %p111_p3, %p53_p0  ;;  %p118_p7 = scmp.lt.s32.totalorder %s773_s14, 3 }
   0xe   : > { %s1088_s19 = scalar_select %p842_p4, 1, 0 }
   0xf   : > { %s1089_s20 = scalar_select %p847_p6, 1, 0 }
  0x10   : > { %p852_p8 = pnand %p534_p5, %p118_p7  ;;  %s775_s22 = smov [#allocation6]  }
  0x11   : > { %s132_s23 = sshll.u32 %s775_s22, 4  ;;  %s31_s25 = sadd.s32 1, %s769_s13  ;;  %s133_s23 = int_to_ptr.vmem [resolvable:$true] %s132_s23 }
  0x12   : > { %s1090_s21 = scalar_select %p852_p8, 1, 0 }
  0x13   : > { %p559_p9 = pneg %p852_p8  ;;  %s629_s28 = scalar_lea.hbm %s1080_s1, 256 }
  0x14   : > { %p630_p12 = scmp.ne.s32.totalorder %s1080_s1, %s629_s28  ;;  %p636_p5 = scmp.lt.u32.totalorder %s629_s28, %s1080_s1 }
  0x15   : > { %p861_p11 = pnand %p559_p9, %p832_p1 }
  0x17   : > { %p631_p13 = pneg %p861_p11 }
  0x19   : > { %p632_p0 = pnand %p631_p13, %p630_p12 }
  0x1b   : > { %p633_p3 = pneg %p632_p0 }
  0x1d   : > { %p638_p7 = pnand %p636_p5, %p633_p3 }
  0x1f   : > { %641 = shalt.err (!%p638_p7)
}
  0x20   : > { %s642_s5 = scalar_lea.vmem %s133_s23, 256  ;;  %p650_p1 = scmp.lt.s32.totalorder %s133_s23, %s133_s23 }
  0x21   : > { %p643_p9 = scmp.ne.s32.totalorder %s133_s23, %s642_s5  ;;  %p651_p4 = scmp.lt.s32.totalorder %s642_s5, %s642_s5 }
  0x23   : > { %p645_p10 = pnand %p643_p9, %p631_p13  ;;  %p652_p8 = por %p651_p4, %p650_p1 }
  0x25   : > { %p646_p6 = pneg %p645_p10 }
  0x27   : > { %p653_p2 = pnand %p652_p8, %p646_p6 }
  0x29   : > { %656 = shalt.err (!%p653_p2)
}
  0x2a   : > { %s776_s6 = smov 128   ;;  %s777_s7 = smov 8  }
  0x2b   : > { %562 = dma.hbm_to_vmem [thread:$0]  (!%p861_p11), %s1080_s1, 256, %s133_s23, [#allocation7], %s776_s6, %s776_s6, %s777_s7  }
  0x2c   : > { %p33_p1 = scmp.ge.s32.totalorder %s31_s25, 2  ;;  %s40_s16 = sadd.s32 1, %s761_s11 }
  0x2d   : > { %p47_p2 = scmp.ne.s32.totalorder %s761_s11, %s757_s10  ;;  %p48_p4 = scmp.eq.s32.totalorder %s773_s14, 0 }
  0x2e   : > { %s1107_s25 = smov (%p33_p1, %s31_s25), 0  ;;  %p1093_p8 = scmp.ne.s32.totalorder %s1087_s18, 0 }
  0x2f   : > { %p891_p6 = por %p48_p4, %p47_p2  ;;  %s35_s26 = ssub.s32 %s769_s13, %s1107_s25 }
  0x30   : > { %p897_p10 = por %p1093_p8, %p47_p2  ;;  %p572_p12 = scmp.lt.s32.totalorder %s773_s14, 2 }
  0x31   : > { %p38_p11 = scmp.eq.s32.totalorder %s35_s26, 0  ;;  %s146_s23 = sand.u32 1, %s761_s11  }
  0x32   : > { %s537_s27 = sshll.u32 %s146_s23, 4  ;;  %s549_s29 = sshll.u32 %s769_s13, 8 }
  0x33   : > { %s906_s28 = scalar_select %p38_p11, %s761_s11, %s40_s16  }
  0x34   : > { %s912_s4 = scalar_lea.hbm %s1079_s0, %s549_s29  ;;  %s150_s18 = scalar_lea.vmem [#allocation3], %s537_s27 }
  0x35   : > { %s158_s5 = sshll.u32 %s150_s18, 4  ;;  %p918_p13 = pnand %p572_p12, %p891_p6  ;;  %s914_s5 = int_to_ptr.vmem [resolvable:$true] %s158_s5 }
  0x36   : > { %s922_s15 = scalar_lea.sflag [#allocation4], %s146_s23  ;;  %s657_s16 = scalar_lea.hbm %s912_s4, 256 }
  0x37   : > { %p658_p0 = scmp.ne.s32.totalorder %s912_s4, %s657_s16  ;;  %p659_p3 = pneg %p918_p13 }
  0x38   : > { %s662_s22 = scalar_lea.hbm %s1079_s0, 512  ;;  %p663_p9 = scmp.lt.u32.totalorder %s912_s4, %s1079_s0 }
  0x39   : > { %p660_p5 = pnand %p659_p3, %p658_p0  ;;  %p664_p1 = scmp.lt.u32.totalorder %s662_s22, %s657_s16 }
  0x3a   : > { %p666_p4 = scmp.lt.u32.totalorder %s657_s16, %s912_s4 }
  0x3b   : > { %p661_p7 = pneg %p660_p5  ;;  %p665_p2 = por %p664_p1, %p663_p9 }
  0x3d   : > { %p667_p6 = por %p666_p4, %p665_p2 }
  0x3f   : > { %p668_p8 = pnand %p667_p6, %p661_p7 }
  0x41   : > { %671 = shalt.err (!%p668_p8)
}
  0x42   : > { %s672_s23 = scalar_lea.vmem %s914_s5, 256  ;;  %s778_s3 = smov [#allocation3]  }
  0x43   : > { %p673_p12 = scmp.ne.s32.totalorder %s914_s5, %s672_s23  ;;  %s677_s18 = sshll.u32 %s778_s3, 4  ;;  %s678_s18 = int_to_ptr.vmem [resolvable:$false] %s677_s18 }
  0x44   : > { %s679_s26 = scalar_lea.vmem %s678_s18, 512  ;;  %p680_p5 = scmp.lt.s32.totalorder %s914_s5, %s678_s18 }
  0x45   : > { %p675_p11 = pnand %p673_p12, %p659_p3  ;;  %p681_p9 = scmp.lt.s32.totalorder %s679_s26, %s672_s23 }
  0x47   : > { %p676_p0 = pneg %p675_p11  ;;  %p682_p1 = por %p681_p9, %p680_p5 }
  0x49   : > { %p683_p2 = pnand %p682_p1, %p676_p0 }
  0x4b   : > { %686 = shalt.err (!%p683_p2)
}
  0x4c   : > { %566 = dma.hbm_to_vmem [thread:$0]  (!%p918_p13), %s912_s4, 256, %s914_s5, %s922_s15, %s776_s6, %s776_s6, %s777_s7  }
  0x4d   : > { %p1096_p3 = scmp.ne.s32.totalorder %s1090_s21, 0 }
  0x4e   : > { %s956_s16 = sand.u32 (!%p1096_p3), 1, %s757_s10   ;;  %p1097_p7 = scmp.ne.s32.totalorder (!%p1096_p3), %s1088_s19, 0 }
  0x4f   : > { %170 = sbr.rel (%p1096_p3) target bundleno = 147 (0x93), region = 28  ;;  %s541_s27 = sshll.u32 (!%p1096_p3), %s956_s16, 4 }
  0x50   : > { %s173_s22 = scalar_lea.sflag (!%p1096_p3), [#allocation4], %s956_s16  ;;  %s176_s8 = scalar_lea.vmem (!%p1096_p3), [#allocation3], %s541_s27 }
  0x56   : > { %740 = dma.done.wait (%p1097_p7), %s173_s22, 256  }
  0x57   : > { %742 = vsyncadd (%p1097_p7), %s173_s22, 4294967040  ;;  %p1098_p13 = scmp.ne.s32.totalorder %s1086_s17, 0 }
  0x59   : > { %744 = dma.done.wait (%p1098_p13), [#allocation7], 256  }
  0x5a   : > { %746 = vsyncadd (%p1098_p13), [#allocation7], 4294967040  ;;  %v212_v0 = vlaneseq  ;;  %v779_v1 = vmov 0.0   ;;  %v973_v4 = vld [vmem:[%s176_s8] sm:$0xff]  ;;  %v202_v8 = vld [vmem:[%s176_s8 + $0x8] sm:$0xff]  ;;  %s200_s17 = scalar_lea.vmem [#allocation8], %s541_s27 }
  0x5b   : > { %204 = vst [vmem:[#allocation2 + $0x8] sm:$0xff] %v779_v1  ;;  %203 = vst [vmem:[#allocation2] sm:$0xff] %v779_v1  ;;  %v207_v5 = vld [vmem:[#allocation6] sm:$0xff]  ;;  %v305_v47 = vld [vmem:[#allocation6 + $0x8] sm:$0xff]  ;;  %s419_s19 = sshll.u32 %s200_s17, 4  ;;  %s550_s21 = sshll.u32 %s765_s12, 8  ;;  %s1025_s19 = int_to_ptr.vmem [resolvable:$true] %s419_s19 }
  0x5c   : > { %v970_v2 = vshrl.u32 %v212_v0, 7  ;;  %205 = vst [vmem:[#allocation2 + $0x10] sm:$0xff] %v973_v4  ;;  %206 = vst [vmem:[#allocation2 + $0x18] sm:$0xff] %v202_v8  ;;  %s1030_s4 = scalar_lea.hbm %s1081_s2, %s550_s21  ;;  %s405_s5 = scalar_lea.sflag [#allocation5], %s956_s16 }
  0x5d   : > { %s687_s12 = scalar_lea.vmem %s1025_s19, 256  ;;  %s780_s15 = smov [#allocation8]  }
  0x5e   : > { %v214_v3 = vsub.s32 0, %v970_v2  ;;  %v226_v7 = vsub.s32 1, %v970_v2  ;;  %v238_v10 = vsub.s32 2, %v970_v2  ;;  %v250_v13 = vsub.s32 3, %v970_v2  ;;  %p688_p4 = scmp.ne.s32.totalorder %s1025_s19, %s687_s12  ;;  %s691_s29 = sshll.u32 %s780_s15, 4  ;;  %s692_s29 = int_to_ptr.vmem [resolvable:$false] %s691_s29 }
  0x5f   : > { %v262_v16 = vsub.s32 4, %v970_v2  ;;  %v274_v22 = vsub.s32 5, %v970_v2  ;;  %v286_v31 = vsub.s32 6, %v970_v2  ;;  %v298_v39 = vsub.s32 7, %v970_v2  ;;  %s693_s30 = scalar_lea.vmem %s692_s29, 512  ;;  %p694_p12 = scmp.lt.s32.totalorder %s1025_s19, %s692_s29 }
  0x60   : > { %v215_v6 = vrot.slane %v207_v5, %v214_v3  ;;  %v227_v12 = vrot.slane %v207_v5, %v226_v7  ;;  %v239_v15 = vrot.slane %v207_v5, %v238_v10  ;;  %v251_v21 = vrot.slane %v207_v5, %v250_v13  ;;  %p689_p6 = pnand %p688_p4, %p897_p10  ;;  %p695_p11 = scmp.lt.s32.totalorder %s693_s30, %s687_s12 }
  0x61   : > { %v263_v29 = vrot.slane %v207_v5, %v262_v16  ;;  %v275_v37 = vrot.slane %v207_v5, %v274_v22  ;;  %v287_v46 = vrot.slane %v207_v5, %v286_v31  ;;  %v313_v53 = vrot.slane %v305_v47, %v214_v3 }
  0x62   : > { %v216_v9 = vmul.f32 %v215_v6, %v973_v4  ;;  %v217_v11 = vmul.f32 %v215_v6, %v202_v8  ;;  %v299_v55 = vrot.slane %v207_v5, %v298_v39  ;;  %v325_v1 = vrot.slane %v305_v47, %v226_v7  ;;  %p690_p8 = pneg %p689_p6  ;;  %p696_p0 = por %p695_p11, %p694_p12 }
  0x63   : > { %v222_v17 = vld [vmem:[#allocation2 + $0xf] sm:$0xff]  ;;  %v223_v23 = vld [vmem:[#allocation2 + $0x17] sm:$0xff]  ;;  %v314_v0 = vmul.f32 0.0, %v313_v53 }
  0x64   : > { %v218_v14 = vadd.f32 %v216_v9, %v973_v4  ;;  %v982_v18 = vld [vmem:[#allocation2 + $0xe] sm:$0xff]  ;;  %v219_v19 = vadd.f32 %v217_v11, %v202_v8  ;;  %v228_v20 = vmul.f32 %v227_v12, %v222_v17  ;;  %v229_v25 = vmul.f32 %v227_v12, %v223_v23  ;;  %v235_v26 = vld [vmem:[#allocation2 + $0x16] sm:$0xff]  ;;  %p697_p5 = pnand %p696_p0, %p690_p8 }
  0x65   : > { %v987_v24 = vld [vmem:[#allocation2 + $0xd] sm:$0xff]  ;;  %v240_v28 = vmul.f32 %v239_v15, %v982_v18  ;;  %v247_v30 = vld [vmem:[#allocation2 + $0x15] sm:$0xff]  ;;  %v241_v34 = vmul.f32 %v239_v15, %v235_v26  ;;  %v315_v9 = vmul.f32 %v313_v53, %v973_v4  ;;  %v344_v26 = vld [vmem:[#allocation2 + $0x5] sm:$0xff]  ;;  %v361_v4 = vrot.slane %v305_v47, %v262_v16 }
  0x66   : > { %v230_v27 = vadd.f32 %v228_v20, %v218_v14  ;;  %v993_v32 = vld [vmem:[#allocation2 + $0xc] sm:$0xff]  ;;  %v231_v33 = vadd.f32 %v229_v25, %v219_v19  ;;  %v252_v36 = vmul.f32 %v251_v21, %v987_v24  ;;  %v259_v38 = vld [vmem:[#allocation2 + $0x14] sm:$0xff]  ;;  %v253_v42 = vmul.f32 %v251_v21, %v247_v30  ;;  %v356_v30 = vld [vmem:[#allocation2 + $0x4] sm:$0xff] }
  0x67   : > { %v999_v40 = vld [vmem:[#allocation2 + $0xb] sm:$0xff]  ;;  %v264_v44 = vmul.f32 %v263_v29, %v993_v32  ;;  %v271_v45 = vld [vmem:[#allocation2 + $0x13] sm:$0xff]  ;;  %v265_v49 = vmul.f32 %v263_v29, %v259_v38  ;;  %v337_v14 = vrot.slane %v305_v47, %v238_v10  ;;  %v349_v20 = vrot.slane %v305_v47, %v250_v13  ;;  %v368_v13 = vld [vmem:[#allocation2 + $0x3] sm:$0xff] }
  0x68   : > { %v242_v35 = vadd.f32 %v240_v28, %v230_v27  ;;  %v243_v41 = vadd.f32 %v241_v34, %v231_v33  ;;  %v282_v50 = vld [vmem:[#allocation2 + $0xa] sm:$0xff]  ;;  %v276_v52 = vmul.f32 %v275_v37, %v999_v40  ;;  %v283_v54 = vld [vmem:[#allocation2 + $0x12] sm:$0xff]  ;;  %v277_v57 = vmul.f32 %v275_v37, %v271_v45  ;;  %v380_v16 = vld [vmem:[#allocation2 + $0x2] sm:$0xff] }
  0x69   : > { %v294_v58 = vld [vmem:[#allocation2 + $0x9] sm:$0xff]  ;;  %v288_v60 = vmul.f32 %v287_v46, %v282_v50  ;;  %v295_v61 = vld [vmem:[#allocation2 + $0x11] sm:$0xff]  ;;  %v289_v63 = vmul.f32 %v287_v46, %v283_v54  ;;  %v327_v25 = vmul.f32 %v325_v1, %v222_v17  ;;  %v339_v29 = vmul.f32 %v337_v14, %v982_v18  ;;  %v392_v45 = vld [vmem:[#allocation2 + $0x1] sm:$0xff] }
  0x6a   : > { %v254_v43 = vadd.f32 %v252_v36, %v242_v35  ;;  %v255_v48 = vadd.f32 %v253_v42, %v243_v41  ;;  %v300_v8 = vmul.f32 %v299_v55, %v294_v58  ;;  %v301_v3 = vmul.f32 %v299_v55, %v295_v61  ;;  %v320_v12 = vld [vmem:[#allocation2 + $0x7] sm:$0xff] }
  0x6b   : > { %v332_v19 = vld [vmem:[#allocation2 + $0x6] sm:$0xff]  ;;  %v326_v23 = vmul.f32 %v325_v1, %v320_v12  ;;  %v350_v34 = vmul.f32 %v349_v20, %v344_v26  ;;  %v373_v35 = vrot.slane %v305_v47, %v274_v22  ;;  %v351_v17 = vmul.f32 %v349_v20, %v987_v24 }
  0x6c   : > { %v266_v51 = vadd.f32 %v264_v44, %v254_v43  ;;  %v267_v56 = vadd.f32 %v265_v49, %v255_v48  ;;  %v338_v28 = vmul.f32 %v337_v14, %v332_v19  ;;  %v362_v38 = vmul.f32 %v361_v4, %v356_v30 }
  0x6d   : > { %v385_v41 = vrot.slane %v305_v47, %v286_v31  ;;  %v363_v42 = vmul.f32 %v361_v4, %v993_v32  ;;  %v374_v44 = vmul.f32 %v373_v35, %v368_v13  ;;  %v397_v22 = vrot.slane %v305_v47, %v298_v39 }
  0x6e   : > { %v278_v59 = vadd.f32 %v276_v52, %v266_v51  ;;  %v279_v62 = vadd.f32 %v277_v57, %v267_v56  ;;  %v375_v48 = vmul.f32 %v373_v35, %v999_v40 }
  0x6f   : > { %v386_v49 = vmul.f32 %v385_v41, %v380_v16  ;;  %v387_v51 = vmul.f32 %v385_v41, %v282_v50  ;;  %v398_v52 = vmul.f32 %v397_v22, %v392_v45  ;;  %v399_v54 = vmul.f32 %v397_v22, %v294_v58 }
  0x70   : > { %v290_v6 = vadd.f32 %v288_v60, %v278_v59  ;;  %v291_v11 = vadd.f32 %v289_v63, %v279_v62 }
  0x72   : > { %v302_v15 = vadd.f32 %v300_v8, %v290_v6  ;;  %v303_v5 = vadd.f32 %v301_v3, %v291_v11 }
  0x74   : > { %v316_v21 = vadd.f32 %v314_v0, %v302_v15  ;;  %v317_v27 = vadd.f32 %v315_v9, %v303_v5 }
  0x76   : > { %v328_v7 = vadd.f32 %v326_v23, %v316_v21  ;;  %v329_v10 = vadd.f32 %v327_v25, %v317_v27 }
  0x78   : > { %v340_v33 = vadd.f32 %v338_v28, %v328_v7  ;;  %v341_v36 = vadd.f32 %v339_v29, %v329_v10 }
  0x7a   : > { %v352_v37 = vadd.f32 %v350_v34, %v340_v33  ;;  %v353_v18 = vadd.f32 %v351_v17, %v341_v36 }
  0x7c   : > { %v364_v43 = vadd.f32 %v362_v38, %v352_v37  ;;  %v365_v46 = vadd.f32 %v363_v42, %v353_v18 }
  0x7e   : > { %v376_v24 = vadd.f32 %v374_v44, %v364_v43  ;;  %v377_v31 = vadd.f32 %v375_v48, %v365_v46 }
  0x80   : > { %v388_v32 = vadd.f32 %v386_v49, %v376_v24  ;;  %v389_v53 = vadd.f32 %v387_v51, %v377_v31 }
  0x82   : > { %v400_v2 = vadd.f32 %v398_v52, %v388_v32  ;;  %v401_v39 = vadd.f32 %v399_v54, %v389_v53 }
  0x84   : > { %402 = vst [vmem:[%s200_s17] sm:$0xff] %v400_v2  ;;  %403 = vst [vmem:[%s200_s17 + $0x8] sm:$0xff] %v401_v39 }
  0x85   : > { %700 = shalt.err (!%p697_p5)
}
  0x86   : > { %s701_s23 = scalar_lea.hbm %s1030_s4, 256  ;;  %s705_s26 = scalar_lea.hbm %s1081_s2, 512 }
  0x87   : > { %p702_p9 = scmp.ne.s32.totalorder %s1030_s4, %s701_s23  ;;  %p706_p3 = scmp.lt.u32.totalorder %s1030_s4, %s1081_s2 }
  0x88   : > { %p707_p7 = scmp.lt.u32.totalorder %s705_s26, %s701_s23  ;;  %p709_p4 = scmp.lt.u32.totalorder %s701_s23, %s1030_s4 }
  0x89   : > { %p703_p1 = pnand %p702_p9, %p897_p10 }
  0x8a   : > { %p708_p13 = por %p707_p7, %p706_p3 }
  0x8b   : > { %p704_p2 = pneg %p703_p1 }
  0x8c   : > { %p710_p6 = por %p709_p4, %p708_p13 }
  0x8e   : > { %p711_p8 = pnand %p710_p6, %p704_p2 }
  0x90   : > { %714 = shalt.err (!%p711_p8)
}
  0x91   : > { %s781_s8 = smov 128   ;;  %s782_s17 = smov 8  }
  0x92   : > { %557 = dma.vmem_to_hbm [thread:$0]  (%p897_p10), %s1025_s19, 256, %s1030_s4, %s405_s5, %s781_s8, %s781_s8, %s782_s17  }
  0x93 PF: > { %s434_s21 = sand.u32 1, %s753_s9   ;;  %p1099_p12 = scmp.ne.s32.totalorder %s1089_s20, 0 }
  0x94   : > { %p1100_p11 = scmp.ge.s32.totalorder %s773_s14, 2  ;;  %s435_s6 = scalar_lea.sflag [#allocation5], %s434_s21 }
  0x96   : > { %p568_p0 = pnand %p1100_p11, %p1099_p12 }
  0x98   : > { %748 = dma.done.wait (!%p568_p0), %s435_s6, 256  }
  0x99   : > { %750 = vsyncadd (!%p568_p0), %s435_s6, 4294967040  ;;  %s19_s14 = sadd.s32 1, %s773_s14   ;;  %s1101_s9 = smov %s757_s10 }
  0x9a   : > { %p16_p5 = scmp.ge.s32.totalorder %s19_s14, 4   ;;  %s1102_s10 = smov %s761_s11 }
  0x9b   : > { %s1103_s11 = smov %s906_s28  ;;  %s1104_s12 = smov %s769_s13 }
  0x9c   : > { %s1105_s13 = smov %s1107_s25  ;;  %18 = sbr.rel (!%p16_p5) target bundleno = 7 (0x7), region = 95 }
  0xa3   :  { %440 = vsyncpa [#allocation4], 1 }
  0xa4   :  { %442 = vsyncpa [#allocation4 + $0x1], 1 }
  0xa5   :  { %443 = vsyncpa [#allocation7], 1 }
  0xa6   :  { %444 = vsyncpa [#allocation5], 1 }
  0xa7   :  { %446 = vsyncpa [#allocation5 + $0x1], 1 }

</bundles_post_ra>
